<compile_context>
chip_gen: v5e
topology: v5e:2x2
jax: 0.10.0
libtpu: 0.0.40
codegen_flags: <defaults>
</compile_context>

<pallas_src>
import functools
import math

import jax
import jax.numpy as jnp
from jax.experimental import pallas as pl
from jax.experimental.pallas import tpu as pltpu


# ----------------------------------------------------------------------------
# Helpers
# ----------------------------------------------------------------------------
def _round_up(x, m):
    return ((x + m - 1) // m) * m


def _choose_tile(dim, cap, quantum):
    """Tile + (possibly padded) extent for one linear-kernel dimension.

    Small dims (<= cap) use a single full-dim tile (block == array dim is
    always legal).  Larger dims get the biggest quantum-aligned tile <= cap
    that divides the dim; if none exists the dim is zero-padded up to a
    multiple of the tile instead of silently emitting one huge full-dim tile.
    """
    if dim <= cap:
        return dim, dim
    t = (cap // quantum) * quantum
    for cand in range(t, quantum - 1, -quantum):
        if dim % cand == 0:
            return cand, dim
    return t, _round_up(dim, t)


def _pick_seq_tile(s, cap, quantum):
    """Largest aligned divisor of the sequence length, capped; full-S fallback."""
    if s <= cap:
        return s
    t = (cap // quantum) * quantum
    while t >= quantum:
        if s % t == 0:
            return t
        t -= quantum
    return s  # TODO(synk): ragged S -> one full-length tile (masked path needed).


def _vmem_limit(tile_bytes):
    """Explicit scoped-VMEM budget: tile footprint + headroom, >= 32 MiB.

    Tile caps below keep the footprint a few MiB, so this stays far under
    v7x's 64 MiB physical VMEM while raising v5e's 16 MiB default."""
    return int(max(tile_bytes + (4 << 20), 32 << 20))


# ----------------------------------------------------------------------------
# Tiled linear kernel:  out[p] = xs[p or 0] @ ws[p].T + bs[p]   (nn.Linear)
# ----------------------------------------------------------------------------
def _linear_kernel(x_ref, w_ref, b_ref, o_ref, acc_ref):
    # x_ref: (1, tm, tk)  w_ref: (1, tn, tk)  b_ref: (1, 1, tn)
    # o_ref: (1, tm, tn)  acc_ref: (tm, tn) f32 scratch
    @pl.when(pl.program_id(3) == 0)
    def _init():
        acc_ref[...] = jnp.zeros_like(acc_ref)

    # Contract against the weight's LAST dim (PyTorch [out, in] layout): the
    # MXU consumes the untransposed weight, f32 accumulation.
    acc_ref[...] += jax.lax.dot_general(
        x_ref[0], w_ref[0],
        dimension_numbers=(((1,), (1,)), ((), ())),
        preferred_element_type=jnp.float32)

    @pl.when(pl.program_id(3) == pl.num_programs(3) - 1)
    def _finalize():
        o_ref[0] = (acc_ref[...] + b_ref[0].astype(jnp.float32)).astype(o_ref.dtype)


def fused_linear(xs, ws, bs, *, tm_cap=512, tn_cap=512, tk_cap=512):
    """Batched nn.Linear: out[p] = xs[p] @ ws[p].T + bs[p].

    xs: [P, M, K] or [1, M, K] (broadcast over weight slots, used for
    self-attention to avoid the 3x activation stack), ws: [P, N, K],
    bs: [P, 1, N] -> [P, M, N] in the input dtype.  K is the innermost
    "arbitrary" reduction axis; P/M/N are "parallel" (megacore-shardable).
    Ragged dims are zero-padded to an aligned tile and sliced back.
    """
    Px, M, K = xs.shape
    P, N, Kw = ws.shape
    assert Kw == K and bs.shape == (P, 1, N) and Px in (1, P)

    tm, Mp = _choose_tile(M, tm_cap, 8)      # sublane quantum
    tn, Np = _choose_tile(N, tn_cap, 128)    # lane quantum (output last dim)
    tk, Kp = _choose_tile(K, tk_cap, 128)    # lane quantum (contraction dim)

    if (Mp, Kp) != (M, K):
        xs = jnp.pad(xs, ((0, 0), (0, Mp - M), (0, Kp - K)))
    if (Np, Kp) != (N, K):
        ws = jnp.pad(ws, ((0, 0), (0, Np - N), (0, Kp - K)))
    if Np != N:
        bs = jnp.pad(bs, ((0, 0), (0, 0), (0, Np - N)))

    grid = (P, Mp // tm, Np // tn, Kp // tk)

    x_map = ((lambda p, i, j, k: (0, i, k)) if Px == 1
             else (lambda p, i, j, k: (p, i, k)))

    itemsize = jnp.dtype(xs.dtype).itemsize
    vmem_bytes = (2 * (tm * tk + tn * tk + tn) * itemsize   # double-buffered in
                  + 2 * tm * tn * itemsize                  # double-buffered out
                  + tm * tn * 4)                            # f32 accumulator

    out = pl.pallas_call(
        _linear_kernel,
        out_shape=jax.ShapeDtypeStruct((P, Mp, Np), xs.dtype),
        grid=grid,
        in_specs=[
            pl.BlockSpec((1, tm, tk), x_map),
            pl.BlockSpec((1, tn, tk), lambda p, i, j, k: (p, j, k)),
            pl.BlockSpec((1, 1, tn), lambda p, i, j, k: (p, 0, j)),
        ],
        out_specs=pl.BlockSpec((1, tm, tn), lambda p, i, j, k: (p, i, j)),
        scratch_shapes=[pltpu.VMEM((tm, tn), jnp.float32)],
        compiler_params=pltpu.CompilerParams(
            dimension_semantics=("parallel", "parallel", "parallel", "arbitrary"),
            vmem_limit_bytes=_vmem_limit(vmem_bytes)),
    )(xs, ws, bs)

    if (Mp, Np) != (M, N):
        out = out[:, :M, :N]
    return out


# ----------------------------------------------------------------------------
# Flash-style attention kernel (online softmax, per-(batch, head, q-tile))
# ----------------------------------------------------------------------------
def _flash_kernel(q_ref, k_ref, v_ref, o_ref, m_ref, l_ref, acc_ref, *, scale):
    # q_ref: (tq, d_k)   k_ref/v_ref: (tkv, d_k)   o_ref: (tq, d_k)
    # m/l: (tq, 1) f32   acc: (tq, d_k) f32 — persist across the kv grid axis.
    ki = pl.program_id(3)

    @pl.when(ki == 0)
    def _init():
        m_ref[...] = jnp.full(m_ref.shape, -jnp.inf, dtype=m_ref.dtype)
        l_ref[...] = jnp.zeros_like(l_ref)
        acc_ref[...] = jnp.zeros_like(acc_ref)

    # Fold 1/sqrt(d_k) into the (tq, d_k) q tile instead of the (tq, tkv) scores.
    q = q_ref[...] * scale
    k = k_ref[...]
    v = v_ref[...]

    # scores = q @ k.T, contracting last dims (no XLU transpose), f32 accumulate.
    s = jax.lax.dot_general(
        q, k, dimension_numbers=(((1,), (1,)), ((), ())),
        preferred_element_type=jnp.float32)
    # TODO(synk): mask path (masked_fill == 0 -> -1e9) would be applied to `s` here.

    m_prev = m_ref[...]
    m_new = jnp.maximum(m_prev, jnp.max(s, axis=-1, keepdims=True))
    alpha = jnp.exp(m_prev - m_new)
    # TODO(synk): on v6e/v7x (d_k<=64) this exp is the bound unit; a bf16 EUP
    #             exp is ~2x there but must NOT be used on v5e (no bf16 EUP).
    p = jnp.exp(s - m_new)

    l_ref[...] = alpha * l_ref[...] + jnp.sum(p, axis=-1, keepdims=True)
    acc_ref[...] = alpha * acc_ref[...] + jax.lax.dot_general(
        p.astype(v.dtype), v, dimension_numbers=(((1,), (0,)), ((), ())),
        preferred_element_type=jnp.float32)
    m_ref[...] = m_new

    @pl.when(ki == pl.num_programs(3) - 1)
    def _finalize():
        # Normalize the (tq, d_k) accumulator with an EUP approx reciprocal
        # instead of dividing the (tq, tkv) probabilities.
        o_ref[...] = (acc_ref[...] *
                      pl.reciprocal(l_ref[...], approx=True)).astype(o_ref.dtype)


def flash_attention(qkv_h, *, tq_cap=256, tkv_cap=512):
    """qkv_h: [3, B, H, S, d_k] (head-split) -> [B, H, S, d_k].

    Grid = (B, H, q-tiles, kv-tiles); kv is the innermost "arbitrary" axis with
    online-softmax scratch, so VMEM stays a constant for any S; the three outer
    "parallel" axes feed the software pipeline and megacore sharding.
    """
    _, B, H, S, d_k = qkv_h.shape
    tq = _pick_seq_tile(S, tq_cap, 8)
    tkv = _pick_seq_tile(S, tkv_cap, 128)
    grid = (B, H, S // tq, S // tkv)

    itemsize = jnp.dtype(qkv_h.dtype).itemsize
    vmem_bytes = (2 * (tq + 2 * tkv) * d_k * itemsize    # double-buffered q/k/v
                  + 2 * tq * d_k * itemsize              # double-buffered out
                  + (2 * tq + tq * d_k) * 4              # m/l/acc scratch
                  + tq * tkv * 4)                        # headroom for scores

    kernel = functools.partial(_flash_kernel, scale=1.0 / math.sqrt(d_k))

    q_spec = pl.BlockSpec((None, None, None, tq, d_k),
                          lambda b, g, qi, ki: (0, b, g, qi, 0))
    k_spec = pl.BlockSpec((None, None, None, tkv, d_k),
                          lambda b, g, qi, ki: (1, b, g, ki, 0))
    v_spec = pl.BlockSpec((None, None, None, tkv, d_k),
                          lambda b, g, qi, ki: (2, b, g, ki, 0))
    o_spec = pl.BlockSpec((None, None, tq, d_k),
                          lambda b, g, qi, ki: (b, g, qi, 0))

    return pl.pallas_call(
        kernel,
        out_shape=jax.ShapeDtypeStruct((B, H, S, d_k), qkv_h.dtype),
        grid=grid,
        in_specs=[q_spec, k_spec, v_spec],
        out_specs=o_spec,
        scratch_shapes=[pltpu.VMEM((tq, 1), jnp.float32),
                        pltpu.VMEM((tq, 1), jnp.float32),
                        pltpu.VMEM((tq, d_k), jnp.float32)],
        compiler_params=pltpu.CompilerParams(
            dimension_semantics=("parallel", "parallel", "parallel", "arbitrary"),
            vmem_limit_bytes=_vmem_limit(vmem_bytes)),
    )(qkv_h, qkv_h, qkv_h)


# ----------------------------------------------------------------------------
# Forward pass
# ----------------------------------------------------------------------------
def prepare_params(params, dtype=jnp.bfloat16):
    """Pre-stack the Q/K/V projection weights/biases ONCE and cast to the MXU
    operand dtype (bf16 by default; accumulation stays f32 in-kernel)."""
    def cast(x):
        return x.astype(dtype) if dtype is not None else x
    return {
        "w_qkv": cast(jnp.stack([params["w0"], params["w1"], params["w2"]], axis=0)),
        "b_qkv": cast(jnp.stack([params["b0"], params["b1"], params["b2"]],
                                axis=0)[:, None, :]),
        "w_out": cast(params["w3"][None]),
        "b_out": cast(params["b3"][None, None, :]),
    }


def multi_headed_attention(prep, query, key=None, value=None, mask=None, *, h):
    """Forward pass of MultiHeadedAttention (mask=None path).

    key/value default to None for self-attention: the QKV projection then
    reads the single activation directly (no stacked 3x copy in HBM).
    """
    assert mask is None, "TODO(synk): mask path (masked_fill -> -1e9) not implemented"
    B, S, D = query.shape
    assert D % h == 0
    d_k = D // h
    M = B * S
    cdt = prep["w_qkv"].dtype  # bf16 operands + f32 accumulation is the intended mode

    q_in = query.astype(cdt).reshape(M, D)
    if key is None and value is None:
        xs = q_in[None]                                        # [1, M, D], no stack
    else:
        k_in = (query if key is None else key).astype(cdt).reshape(M, D)
        v_in = (query if value is None else value).astype(cdt).reshape(M, D)
        xs = jnp.stack([q_in, k_in, v_in], axis=0)             # [3, M, D]

    # Fused Q/K/V projection: one tiled pallas_call over a leading size-3 axis.
    qkv = fused_linear(xs, prep["w_qkv"], prep["b_qkv"])       # [3, M, D]

    # Head-split layout [3, B, h, S, d_k]: every per-(head, tile) block starts
    # at lane 0 (no per-head lane rotations) and is one contiguous DMA slab.
    qkv_h = qkv.reshape(3, B, S, h, d_k).transpose(0, 1, 3, 2, 4)

    attn = flash_attention(qkv_h)                              # [B, h, S, d_k]

    # The reference does attn_output.view(B, -1, h*d_k) directly on the
    # [B, h, S, d_k] tensor (NO transpose back): the row-major reshape below is
    # exactly that view — zero-copy.
    attn_flat = attn.reshape(1, M, D)

    out = fused_linear(attn_flat, prep["w_out"], prep["b_out"])  # [1, M, D]
    return out.reshape(B, S, D)


# ----------------------------------------------------------------------------
# Reference (plain JAX) for sanity check
# ----------------------------------------------------------------------------
def reference_mha(params, query, key, value, *, h):
    B, S, d_model = query.shape
    d_k = d_model // h

    def lin(x, i):
        return x @ params[f"w{i}"].T + params[f"b{i}"]

    q = lin(query, 0).reshape(B, S, h, d_k).transpose(0, 2, 1, 3)
    k = lin(key, 1).reshape(B, S, h, d_k).transpose(0, 2, 1, 3)
    v = lin(value, 2).reshape(B, S, h, d_k).transpose(0, 2, 1, 3)
    scores = jnp.einsum("bhqd,bhkd->bhqk", q, k) / math.sqrt(d_k)
    p = jax.nn.softmax(scores, axis=-1)
    o = jnp.einsum("bhqk,bhkd->bhqd", p, v).reshape(B, -1, h * d_k)
    return lin(o, 3)


# ----------------------------------------------------------------------------
# Main
# ----------------------------------------------------------------------------
if __name__ == "__main__":
    B, S, d_model, h = 2, 8, 32, 4

    key0 = jax.random.PRNGKey(0)
    keys = jax.random.split(key0, 12)

    # Deterministic synthetic parameters (4 x nn.Linear(d_model, d_model)).
    bound = 1.0 / math.sqrt(d_model)
    params = {}
    for i in range(4):
        params[f"w{i}"] = jax.random.uniform(
            keys[i], (d_model, d_model), jnp.float32, -bound, bound)
        params[f"b{i}"] = jax.random.uniform(
            keys[4 + i], (d_model,), jnp.float32, -bound, bound)

    query = jax.random.normal(keys[8], (B, S, d_model), jnp.float32)
    key_in = jax.random.normal(keys[9], (B, S, d_model), jnp.float32)
    value = jax.random.normal(keys[10], (B, S, d_model), jnp.float32)

    fwd = jax.jit(functools.partial(multi_headed_attention, h=h))
    ref_cross = reference_mha(params, query, key_in, value, h=h)
    ref_self = reference_mha(params, query, query, query, h=h)

    # --- f32 path: tight check of kernel semantics (tolerance covers the EUP
    #     approx reciprocal; layout bugs would show as O(0.1+) errors). ---
    prep32 = prepare_params(params, dtype=jnp.float32)
    out32 = jax.block_until_ready(fwd(prep32, query, key_in, value))
    assert out32.shape == (B, S, d_model)
    err32 = float(jnp.max(jnp.abs(out32 - ref_cross)))
    assert jnp.allclose(out32, ref_cross, atol=1e-2, rtol=1e-2), (
        f"f32 cross-attention mismatch (max abs err {err32:.3e})")

    out32_self = jax.block_until_ready(fwd(prep32, query))      # self-attn, no stack
    err32s = float(jnp.max(jnp.abs(out32_self - ref_self)))
    assert jnp.allclose(out32_self, ref_self, atol=1e-2, rtol=1e-2), (
        f"f32 self-attention mismatch (max abs err {err32s:.3e})")

    # --- bf16 path: production MXU-operand dtype (f32 accumulation); looser
    #     tolerance for bf16 operand rounding. ---
    prep16 = prepare_params(params, dtype=jnp.bfloat16)
    out16 = jax.block_until_ready(fwd(prep16, query, key_in, value))
    err16 = float(jnp.max(jnp.abs(out16.astype(jnp.float32) - ref_cross)))
    assert jnp.allclose(out16.astype(jnp.float32), ref_cross,
                        atol=5e-2, rtol=5e-2), (
        f"bf16 cross-attention mismatch (max abs err {err16:.3e})")

    print("KERNEL_OK")
</pallas_src>

<mosaic_0001>
module attributes {stable_mosaic.version = 11 : i64} {
  func.func @_linear_kernel(%arg0: i32, %arg1: i32, %arg2: i32, %arg3: i32, %arg4: memref<1x16x32xf32, #tpu.memory_space<vmem>>, %arg5: memref<1x32x32xf32, #tpu.memory_space<vmem>>, %arg6: memref<1x1x32xf32, #tpu.memory_space<vmem>>, %arg7: memref<1x16x32xf32, #tpu.memory_space<vmem>>, %arg8: memref<16x32xf32, #tpu.memory_space<vmem>>) attributes {dimension_semantics = [#tpu.dimension_semantics<parallel>, #tpu.dimension_semantics<parallel>, #tpu.dimension_semantics<parallel>, #tpu.dimension_semantics<arbitrary>], iteration_bounds = array<i64: 3, 1, 1, 1>, scalar_prefetch = 0 : i64, scratch_operands = 1 : i64, tpu.core_type = #tpu.core_type<tc>, window_params = [{transform_indices = @transform_0, window_bounds = array<i64: 1, 16, 32>}, {transform_indices = @transform_1, window_bounds = array<i64: 1, 32, 32>}, {transform_indices = @transform_2, window_bounds = array<i64: 1, 1, 32>}, {transform_indices = @transform_3, window_bounds = array<i64: 1, 16, 32>}]} {
    %c0_i32 = arith.constant 0 : i32
    %0 = arith.cmpi eq, %arg3, %c0_i32 : i32
    %1 = arith.extui %0 : i1 to i32
    %c0_i32_0 = arith.constant 0 : i32
    %2 = arith.cmpi ne, %1, %c0_i32_0 : i32
    scf.if %2 {
      %cst_12 = arith.constant 0.000000e+00 : f32
      %14 = vector.broadcast %cst_12 : f32 to vector<16x32xf32>
      %c0_13 = arith.constant 0 : index
      %c0_14 = arith.constant 0 : index
      %15 = vector.load %arg8[%c0_13, %c0_14] : memref<16x32xf32, #tpu.memory_space<vmem>>, vector<16x32xf32>
      tpu.vector_store %arg8[%c0_13, %c0_14], %14 {strides = array<i32>} : memref<16x32xf32, #tpu.memory_space<vmem>>, vector<16x32xf32>,
    } else {
    }
    %c0 = arith.constant 0 : index
    %c0_1 = arith.constant 0 : index
    %3 = vector.load %arg8[%c0, %c0_1] : memref<16x32xf32, #tpu.memory_space<vmem>>, vector<16x32xf32>
    %c0_2 = arith.constant 0 : index
    %c0_3 = arith.constant 0 : index
    %c0_4 = arith.constant 0 : index
    %4 = vector.load %arg4[%c0_2, %c0_3, %c0_4] : memref<1x16x32xf32, #tpu.memory_space<vmem>>, vector<1x16x32xf32>
    %5 = vector.shape_cast %4 : vector<1x16x32xf32> to vector<16x32xf32>
    %c0_5 = arith.constant 0 : index
    %c0_6 = arith.constant 0 : index
    %c0_7 = arith.constant 0 : index
    %6 = vector.load %arg5[%c0_5, %c0_6, %c0_7] : memref<1x32x32xf32, #tpu.memory_space<vmem>>, vector<1x32x32xf32>
    %7 = vector.shape_cast %6 : vector<1x32x32xf32> to vector<32x32xf32>
    %cst = arith.constant dense<0.000000e+00> : vector<16x32xf32>
    %8 = tpu.matmul %5, %7, %cst {dimension_numbers = #tpu.dot_dimension_numbers<[1], [1], [0], [0], [0, 0, 1, 0], [], []>} : vector<16x32xf32>, vector<32x32xf32>, vector<16x32xf32> -> vector<16x32xf32>
    %9 = arith.addf %3, %8 : vector<16x32xf32>
    %c0_8 = arith.constant 0 : index
    %c0_9 = arith.constant 0 : index
    %10 = vector.load %arg8[%c0_8, %c0_9] : memref<16x32xf32, #tpu.memory_space<vmem>>, vector<16x32xf32>
    tpu.vector_store %arg8[%c0_8, %c0_9], %9 {strides = array<i32>} : memref<16x32xf32, #tpu.memory_space<vmem>>, vector<16x32xf32>,
    %c0_i32_10 = arith.constant 0 : i32
    %11 = arith.cmpi eq, %arg3, %c0_i32_10 : i32
    %12 = arith.extui %11 : i1 to i32
    %c0_i32_11 = arith.constant 0 : i32
    %13 = arith.cmpi ne, %12, %c0_i32_11 : i32
    scf.if %13 {
      %c0_12 = arith.constant 0 : index
      %c0_13 = arith.constant 0 : index
      %14 = vector.load %arg8[%c0_12, %c0_13] : memref<16x32xf32, #tpu.memory_space<vmem>>, vector<16x32xf32>
      %c0_14 = arith.constant 0 : index
      %c0_15 = arith.constant 0 : index
      %c0_16 = arith.constant 0 : index
      %15 = vector.load %arg6[%c0_14, %c0_15, %c0_16] : memref<1x1x32xf32, #tpu.memory_space<vmem>>, vector<1x1x32xf32>
      %16 = vector.shape_cast %15 : vector<1x1x32xf32> to vector<1x32xf32>
      %17 = vector.broadcast %16 : vector<1x32xf32> to vector<16x32xf32>
      %18 = arith.addf %14, %17 : vector<16x32xf32>
      %c0_17 = arith.constant 0 : index
      %c0_18 = arith.constant 0 : index
      %c0_19 = arith.constant 0 : index
      %19 = vector.load %arg7[%c0_17, %c0_18, %c0_19] : memref<1x16x32xf32, #tpu.memory_space<vmem>>, vector<1x16x32xf32>
      %20 = vector.shape_cast %19 : vector<1x16x32xf32> to vector<16x32xf32>
      %21 = vector.shape_cast %18 : vector<16x32xf32> to vector<1x16x32xf32>
      tpu.vector_store %arg7[%c0_17, %c0_18, %c0_19], %21 {strides = array<i32>} : memref<1x16x32xf32, #tpu.memory_space<vmem>>, vector<1x16x32xf32>,
    } else {
    }
    return
  }
  func.func @transform_0(%arg0: i32, %arg1: i32, %arg2: i32, %arg3: i32) -> (i32, i32, i32) {
    %c0_i32 = arith.constant 0 : i32
    return %arg0, %arg1, %arg3 : i32, i32, i32
  }
  func.func @transform_1(%arg0: i32, %arg1: i32, %arg2: i32, %arg3: i32) -> (i32, i32, i32) {
    %c0_i32 = arith.constant 0 : i32
    return %arg0, %arg2, %arg3 : i32, i32, i32
  }
  func.func @transform_2(%arg0: i32, %arg1: i32, %arg2: i32, %arg3: i32) -> (i32, i32, i32) {
    %c0_i32 = arith.constant 0 : i32
    %c0_i32_0 = arith.constant 0 : i32
    return %arg0, %c0_i32, %arg2 : i32, i32, i32
  }
  func.func @transform_3(%arg0: i32, %arg1: i32, %arg2: i32, %arg3: i32) -> (i32, i32, i32) {
    %c0_i32 = arith.constant 0 : i32
    return %arg0, %arg1, %arg2 : i32, i32, i32
  }
}

module attributes {stable_mosaic.version = 11 : i64} {
  func.func @_linear_kernel(%arg0: i32, %arg1: i32, %arg2: i32, %arg3: i32, %arg4: memref<1x16x32xf32, #tpu.memory_space<vmem>>, %arg5: memref<1x32x32xf32, #tpu.memory_space<vmem>>, %arg6: memref<1x1x32xf32, #tpu.memory_space<vmem>>, %arg7: memref<1x16x32xf32, #tpu.memory_space<vmem>>, %arg8: memref<16x32xf32, #tpu.memory_space<vmem>>) attributes {dimension_semantics = [#tpu.dimension_semantics<parallel>, #tpu.dimension_semantics<parallel>, #tpu.dimension_semantics<parallel>, #tpu.dimension_semantics<arbitrary>], iteration_bounds = array<i64: 1, 1, 1, 1>, scalar_prefetch = 0 : i64, scratch_operands = 1 : i64, tpu.core_type = #tpu.core_type<tc>, window_params = [{transform_indices = @transform_0, window_bounds = array<i64: 1, 16, 32>}, {transform_indices = @transform_1, window_bounds = array<i64: 1, 32, 32>}, {transform_indices = @transform_2, window_bounds = array<i64: 1, 1, 32>}, {transform_indices = @transform_3, window_bounds = array<i64: 1, 16, 32>}]} {
    %c0_i32 = arith.constant 0 : i32
    %0 = arith.cmpi eq, %arg3, %c0_i32 : i32
    %1 = arith.extui %0 : i1 to i32
    %c0_i32_0 = arith.constant 0 : i32
    %2 = arith.cmpi ne, %1, %c0_i32_0 : i32
    scf.if %2 {
      %cst_12 = arith.constant 0.000000e+00 : f32
      %14 = vector.broadcast %cst_12 : f32 to vector<16x32xf32>
      %c0_13 = arith.constant 0 : index
      %c0_14 = arith.constant 0 : index
      %15 = vector.load %arg8[%c0_13, %c0_14] : memref<16x32xf32, #tpu.memory_space<vmem>>, vector<16x32xf32>
      tpu.vector_store %arg8[%c0_13, %c0_14], %14 {strides = array<i32>} : memref<16x32xf32, #tpu.memory_space<vmem>>, vector<16x32xf32>,
    } else {
    }
    %c0 = arith.constant 0 : index
    %c0_1 = arith.constant 0 : index
    %3 = vector.load %arg8[%c0, %c0_1] : memref<16x32xf32, #tpu.memory_space<vmem>>, vector<16x32xf32>
    %c0_2 = arith.constant 0 : index
    %c0_3 = arith.constant 0 : index
    %c0_4 = arith.constant 0 : index
    %4 = vector.load %arg4[%c0_2, %c0_3, %c0_4] : memref<1x16x32xf32, #tpu.memory_space<vmem>>, vector<1x16x32xf32>
    %5 = vector.shape_cast %4 : vector<1x16x32xf32> to vector<16x32xf32>
    %c0_5 = arith.constant 0 : index
    %c0_6 = arith.constant 0 : index
    %c0_7 = arith.constant 0 : index
    %6 = vector.load %arg5[%c0_5, %c0_6, %c0_7] : memref<1x32x32xf32, #tpu.memory_space<vmem>>, vector<1x32x32xf32>
    %7 = vector.shape_cast %6 : vector<1x32x32xf32> to vector<32x32xf32>
    %cst = arith.constant dense<0.000000e+00> : vector<16x32xf32>
    %8 = tpu.matmul %5, %7, %cst {dimension_numbers = #tpu.dot_dimension_numbers<[1], [1], [0], [0], [0, 0, 1, 0], [], []>} : vector<16x32xf32>, vector<32x32xf32>, vector<16x32xf32> -> vector<16x32xf32>
    %9 = arith.addf %3, %8 : vector<16x32xf32>
    %c0_8 = arith.constant 0 : index
    %c0_9 = arith.constant 0 : index
    %10 = vector.load %arg8[%c0_8, %c0_9] : memref<16x32xf32, #tpu.memory_space<vmem>>, vector<16x32xf32>
    tpu.vector_store %arg8[%c0_8, %c0_9], %9 {strides = array<i32>} : memref<16x32xf32, #tpu.memory_space<vmem>>, vector<16x32xf32>,
    %c0_i32_10 = arith.constant 0 : i32
    %11 = arith.cmpi eq, %arg3, %c0_i32_10 : i32
    %12 = arith.extui %11 : i1 to i32
    %c0_i32_11 = arith.constant 0 : i32
    %13 = arith.cmpi ne, %12, %c0_i32_11 : i32
    scf.if %13 {
      %c0_12 = arith.constant 0 : index
      %c0_13 = arith.constant 0 : index
      %14 = vector.load %arg8[%c0_12, %c0_13] : memref<16x32xf32, #tpu.memory_space<vmem>>, vector<16x32xf32>
      %c0_14 = arith.constant 0 : index
      %c0_15 = arith.constant 0 : index
      %c0_16 = arith.constant 0 : index
      %15 = vector.load %arg6[%c0_14, %c0_15, %c0_16] : memref<1x1x32xf32, #tpu.memory_space<vmem>>, vector<1x1x32xf32>
      %16 = vector.shape_cast %15 : vector<1x1x32xf32> to vector<1x32xf32>
      %17 = vector.broadcast %16 : vector<1x32xf32> to vector<16x32xf32>
      %18 = arith.addf %14, %17 : vector<16x32xf32>
      %c0_17 = arith.constant 0 : index
      %c0_18 = arith.constant 0 : index
      %c0_19 = arith.constant 0 : index
      %19 = vector.load %arg7[%c0_17, %c0_18, %c0_19] : memref<1x16x32xf32, #tpu.memory_space<vmem>>, vector<1x16x32xf32>
      %20 = vector.shape_cast %19 : vector<1x16x32xf32> to vector<16x32xf32>
      %21 = vector.shape_cast %18 : vector<16x32xf32> to vector<1x16x32xf32>
      tpu.vector_store %arg7[%c0_17, %c0_18, %c0_19], %21 {strides = array<i32>} : memref<1x16x32xf32, #tpu.memory_space<vmem>>, vector<1x16x32xf32>,
    } else {
    }
    return
  }
  func.func @transform_0(%arg0: i32, %arg1: i32, %arg2: i32, %arg3: i32) -> (i32, i32, i32) {
    %c0_i32 = arith.constant 0 : i32
    %c0_i32_0 = arith.constant 0 : i32
    return %c0_i32, %arg1, %arg3 : i32, i32, i32
  }
  func.func @transform_1(%arg0: i32, %arg1: i32, %arg2: i32, %arg3: i32) -> (i32, i32, i32) {
    %c0_i32 = arith.constant 0 : i32
    return %arg0, %arg2, %arg3 : i32, i32, i32
  }
  func.func @transform_2(%arg0: i32, %arg1: i32, %arg2: i32, %arg3: i32) -> (i32, i32, i32) {
    %c0_i32 = arith.constant 0 : i32
    %c0_i32_0 = arith.constant 0 : i32
    return %arg0, %c0_i32, %arg2 : i32, i32, i32
  }
  func.func @transform_3(%arg0: i32, %arg1: i32, %arg2: i32, %arg3: i32) -> (i32, i32, i32) {
    %c0_i32 = arith.constant 0 : i32
    return %arg0, %arg1, %arg2 : i32, i32, i32
  }
}

module attributes {stable_mosaic.version = 11 : i64} {
  func.func @_flash_kernel(%arg0: i32, %arg1: i32, %arg2: i32, %arg3: i32, %arg4: memref<1x1x1x8x8xf32, #tpu.memory_space<vmem>>, %arg5: memref<1x1x1x8x8xf32, #tpu.memory_space<vmem>>, %arg6: memref<1x1x1x8x8xf32, #tpu.memory_space<vmem>>, %arg7: memref<1x1x8x8xf32, #tpu.memory_space<vmem>>, %arg8: memref<8x1xf32, #tpu.memory_space<vmem>>, %arg9: memref<8x1xf32, #tpu.memory_space<vmem>>, %arg10: memref<8x8xf32, #tpu.memory_space<vmem>>) attributes {dimension_semantics = [#tpu.dimension_semantics<parallel>, #tpu.dimension_semantics<parallel>, #tpu.dimension_semantics<parallel>, #tpu.dimension_semantics<arbitrary>], iteration_bounds = array<i64: 2, 4, 1, 1>, scalar_prefetch = 0 : i64, scratch_operands = 3 : i64, tpu.core_type = #tpu.core_type<tc>, window_params = [{transform_indices = @transform_0, window_bounds = array<i64: 1, 1, 1, 8, 8>}, {transform_indices = @transform_1, window_bounds = array<i64: 1, 1, 1, 8, 8>}, {transform_indices = @transform_2, window_bounds = array<i64: 1, 1, 1, 8, 8>}, {transform_indices = @transform_3, window_bounds = array<i64: 1, 1, 8, 8>}]} {
    %c0_i32 = arith.constant 0 : i32
    %0 = arith.cmpi eq, %arg3, %c0_i32 : i32
    %1 = arith.extui %0 : i1 to i32
    %c0_i32_0 = arith.constant 0 : i32
    %2 = arith.cmpi ne, %1, %c0_i32_0 : i32
    scf.if %2 {
      %cst_33 = arith.constant 0xFF800000 : f32
      %37 = vector.broadcast %cst_33 : f32 to vector<8x1xf32>
      %c0_34 = arith.constant 0 : index
      %c0_35 = arith.constant 0 : index
      %38 = vector.load %arg8[%c0_34, %c0_35] : memref<8x1xf32, #tpu.memory_space<vmem>>, vector<8x1xf32>
      tpu.vector_store %arg8[%c0_34, %c0_35], %37 {strides = array<i32>} : memref<8x1xf32, #tpu.memory_space<vmem>>, vector<8x1xf32>,
      %cst_36 = arith.constant 0.000000e+00 : f32
      %39 = vector.broadcast %cst_36 : f32 to vector<8x1xf32>
      %c0_37 = arith.constant 0 : index
      %c0_38 = arith.constant 0 : index
      %40 = vector.load %arg9[%c0_37, %c0_38] : memref<8x1xf32, #tpu.memory_space<vmem>>, vector<8x1xf32>
      tpu.vector_store %arg9[%c0_37, %c0_38], %39 {strides = array<i32>} : memref<8x1xf32, #tpu.memory_space<vmem>>, vector<8x1xf32>,
      %cst_39 = arith.constant 0.000000e+00 : f32
      %41 = vector.broadcast %cst_39 : f32 to vector<8x8xf32>
      %c0_40 = arith.constant 0 : index
      %c0_41 = arith.constant 0 : index
      %42 = vector.load %arg10[%c0_40, %c0_41] : memref<8x8xf32, #tpu.memory_space<vmem>>, vector<8x8xf32>
      tpu.vector_store %arg10[%c0_40, %c0_41], %41 {strides = array<i32>} : memref<8x8xf32, #tpu.memory_space<vmem>>, vector<8x8xf32>,
    } else {
    }
    %c0 = arith.constant 0 : index
    %c0_1 = arith.constant 0 : index
    %c0_2 = arith.constant 0 : index
    %c0_3 = arith.constant 0 : index
    %c0_4 = arith.constant 0 : index
    %3 = vector.load %arg4[%c0, %c0_1, %c0_2, %c0_3, %c0_4] : memref<1x1x1x8x8xf32, #tpu.memory_space<vmem>>, vector<1x1x1x8x8xf32>
    %4 = vector.shape_cast %3 : vector<1x1x1x8x8xf32> to vector<8x8xf32>
    %cst = arith.constant 0.353553385 : f32
    %5 = vector.broadcast %cst : f32 to vector<8x8xf32>
    %6 = arith.mulf %4, %5 : vector<8x8xf32>
    %c0_5 = arith.constant 0 : index
    %c0_6 = arith.constant 0 : index
    %c0_7 = arith.constant 0 : index
    %c0_8 = arith.constant 0 : index
    %c0_9 = arith.constant 0 : index
    %7 = vector.load %arg5[%c0_5, %c0_6, %c0_7, %c0_8, %c0_9] : memref<1x1x1x8x8xf32, #tpu.memory_space<vmem>>, vector<1x1x1x8x8xf32>
    %8 = vector.shape_cast %7 : vector<1x1x1x8x8xf32> to vector<8x8xf32>
    %c0_10 = arith.constant 0 : index
    %c0_11 = arith.constant 0 : index
    %c0_12 = arith.constant 0 : index
    %c0_13 = arith.constant 0 : index
    %c0_14 = arith.constant 0 : index
    %9 = vector.load %arg6[%c0_10, %c0_11, %c0_12, %c0_13, %c0_14] : memref<1x1x1x8x8xf32, #tpu.memory_space<vmem>>, vector<1x1x1x8x8xf32>
    %10 = vector.shape_cast %9 : vector<1x1x1x8x8xf32> to vector<8x8xf32>
    %cst_15 = arith.constant dense<0.000000e+00> : vector<8x8xf32>
    %11 = tpu.matmul %6, %8, %cst_15 {dimension_numbers = #tpu.dot_dimension_numbers<[1], [1], [0], [0], [0, 0, 1, 0], [], []>} : vector<8x8xf32>, vector<8x8xf32>, vector<8x8xf32> -> vector<8x8xf32>
    %c0_16 = arith.constant 0 : index
    %c0_17 = arith.constant 0 : index
    %12 = vector.load %arg8[%c0_16, %c0_17] : memref<8x1xf32, #tpu.memory_space<vmem>>, vector<8x1xf32>
    %cst_18 = arith.constant dense<0xFF800000> : vector<8xf32>
    %13 = vector.multi_reduction <maximumf>, %11, %cst_18 [1] : vector<8x8xf32> to vector<8xf32>
    %14 = vector.shape_cast %13 : vector<8xf32> to vector<8x1xf32>
    %15 = arith.maximumf %12, %14 : vector<8x1xf32>
    %16 = arith.subf %12, %15 : vector<8x1xf32>
    %17 = math.exp %16 : vector<8x1xf32>
    %18 = vector.broadcast %15 : vector<8x1xf32> to vector<8x8xf32>
    %19 = arith.subf %11, %18 : vector<8x8xf32>
    %20 = math.exp %19 : vector<8x8xf32>
    %c0_19 = arith.constant 0 : index
    %c0_20 = arith.constant 0 : index
    %21 = vector.load %arg9[%c0_19, %c0_20] : memref<8x1xf32, #tpu.memory_space<vmem>>, vector<8x1xf32>
    %22 = arith.mulf %17, %21 : vector<8x1xf32>
    %cst_21 = arith.constant dense<0.000000e+00> : vector<8xf32>
    %23 = vector.multi_reduction <add>, %20, %cst_21 [1] : vector<8x8xf32> to vector<8xf32>
    %24 = vector.shape_cast %23 : vector<8xf32> to vector<8x1xf32>
    %25 = arith.addf %22, %24 : vector<8x1xf32>
    %c0_22 = arith.constant 0 : index
    %c0_23 = arith.constant 0 : index
    %26 = vector.load %arg9[%c0_22, %c0_23] : memref<8x1xf32, #tpu.memory_space<vmem>>, vector<8x1xf32>
    tpu.vector_store %arg9[%c0_22, %c0_23], %25 {strides = array<i32>} : memref<8x1xf32, #tpu.memory_space<vmem>>, vector<8x1xf32>,
    %c0_24 = arith.constant 0 : index
    %c0_25 = arith.constant 0 : index
    %27 = vector.load %arg10[%c0_24, %c0_25] : memref<8x8xf32, #tpu.memory_space<vmem>>, vector<8x8xf32>
    %28 = vector.broadcast %17 : vector<8x1xf32> to vector<8x8xf32>
    %29 = arith.mulf %28, %27 : vector<8x8xf32>
    %cst_26 = arith.constant dense<0.000000e+00> : vector<8x8xf32>
    %30 = tpu.matmul %20, %10, %cst_26 {dimension_numbers = #tpu.dot_dimension_numbers<[1], [0], [0], [1], [0, 0, 1, 1], [], []>} : vector<8x8xf32>, vector<8x8xf32>, vector<8x8xf32> -> vector<8x8xf32>
    %31 = arith.addf %29, %30 : vector<8x8xf32>
    %c0_27 = arith.constant 0 : index
    %c0_28 = arith.constant 0 : index
    %32 = vector.load %arg10[%c0_27, %c0_28] : memref<8x8xf32, #tpu.memory_space<vmem>>, vector<8x8xf32>
    tpu.vector_store %arg10[%c0_27, %c0_28], %31 {strides = array<i32>} : memref<8x8xf32, #tpu.memory_space<vmem>>, vector<8x8xf32>,
    %c0_29 = arith.constant 0 : index
    %c0_30 = arith.constant 0 : index
    %33 = vector.load %arg8[%c0_29, %c0_30] : memref<8x1xf32, #tpu.memory_space<vmem>>, vector<8x1xf32>
    tpu.vector_store %arg8[%c0_29, %c0_30], %15 {strides = array<i32>} : memref<8x1xf32, #tpu.memory_space<vmem>>, vector<8x1xf32>,
    %c0_i32_31 = arith.constant 0 : i32
    %34 = arith.cmpi eq, %arg3, %c0_i32_31 : i32
    %35 = arith.extui %34 : i1 to i32
    %c0_i32_32 = arith.constant 0 : i32
    %36 = arith.cmpi ne, %35, %c0_i32_32 : i32
    scf.if %36 {
      %c0_33 = arith.constant 0 : index
      %c0_34 = arith.constant 0 : index
      %37 = vector.load %arg10[%c0_33, %c0_34] : memref<8x8xf32, #tpu.memory_space<vmem>>, vector<8x8xf32>
      %c0_35 = arith.constant 0 : index
      %c0_36 = arith.constant 0 : index
      %38 = vector.load %arg9[%c0_35, %c0_36] : memref<8x1xf32, #tpu.memory_space<vmem>>, vector<8x1xf32>
      %39 = tpu.reciprocal %38 {approx = true} : vector<8x1xf32> -> vector<8x1xf32>
      %40 = vector.broadcast %39 : vector<8x1xf32> to vector<8x8xf32>
      %41 = arith.mulf %37, %40 : vector<8x8xf32>
      %c0_37 = arith.constant 0 : index
      %c0_38 = arith.constant 0 : index
      %c0_39 = arith.constant 0 : index
      %c0_40 = arith.constant 0 : index
      %42 = vector.load %arg7[%c0_37, %c0_38, %c0_39, %c0_40] : memref<1x1x8x8xf32, #tpu.memory_space<vmem>>, vector<1x1x8x8xf32>
      %43 = vector.shape_cast %42 : vector<1x1x8x8xf32> to vector<8x8xf32>
      %44 = vector.shape_cast %41 : vector<8x8xf32> to vector<1x1x8x8xf32>
      tpu.vector_store %arg7[%c0_37, %c0_38, %c0_39, %c0_40], %44 {strides = array<i32>} : memref<1x1x8x8xf32, #tpu.memory_space<vmem>>, vector<1x1x8x8xf32>,
    } else {
    }
    return
  }
  func.func @transform_0(%arg0: i32, %arg1: i32, %arg2: i32, %arg3: i32) -> (i32, i32, i32, i32, i32) {
    %c0_i32 = arith.constant 0 : i32
    %c0_i32_0 = arith.constant 0 : i32
    %c0_i32_1 = arith.constant 0 : i32
    return %c0_i32, %arg0, %arg1, %arg2, %c0_i32_0 : i32, i32, i32, i32, i32
  }
  func.func @transform_1(%arg0: i32, %arg1: i32, %arg2: i32, %arg3: i32) -> (i32, i32, i32, i32, i32) {
    %c1_i32 = arith.constant 1 : i32
    %c0_i32 = arith.constant 0 : i32
    %c0_i32_0 = arith.constant 0 : i32
    return %c1_i32, %arg0, %arg1, %arg3, %c0_i32 : i32, i32, i32, i32, i32
  }
  func.func @transform_2(%arg0: i32, %arg1: i32, %arg2: i32, %arg3: i32) -> (i32, i32, i32, i32, i32) {
    %c2_i32 = arith.constant 2 : i32
    %c0_i32 = arith.constant 0 : i32
    %c0_i32_0 = arith.constant 0 : i32
    return %c2_i32, %arg0, %arg1, %arg3, %c0_i32 : i32, i32, i32, i32, i32
  }
  func.func @transform_3(%arg0: i32, %arg1: i32, %arg2: i32, %arg3: i32) -> (i32, i32, i32, i32) {
    %c0_i32 = arith.constant 0 : i32
    %c0_i32_0 = arith.constant 0 : i32
    return %arg0, %arg1, %arg2, %c0_i32 : i32, i32, i32, i32
  }
}

</mosaic_0001>

<bundles_post_ra>
// kernel: multi_headed_attention.3
= control target key start
LH: loop header
LB: loop body
LE: loop exit
PB: predicated region body
PF: predicated region fallthrough
CT: control target
= control target key end

     0   :  { %s625_s12 = smov 0   ;;  %s627_s13 = smov 0   ;;  %s685_s0 = inlined_call_operand.vmem [shape: f32[3,16,32], index: 0, kind: input, shape index: {}]   ;;  %s686_s1 = inlined_call_operand.vmem [shape: f32[3,32,32], index: 1, kind: input, shape index: {}]   ;;  %s687_s2 = inlined_call_operand.vmem [shape: f32[3,1,32], index: 2, kind: input, shape index: {}]   ;;  %s688_s3 = inlined_call_operand.vmem [shape: f32[3,16,32], index: 3, kind: output, shape index: {}]  }
   0x1   :  { %s629_s14 = smov 0  }
   0x2 LB: > { %s39_s15 = sadd.s32 1, %s598_s13  ;;  %p532_p0 = scmp.ge.s32.totalorder %s602_s14, 1  ;;  %s602_s14 = sphi %s629_s14, %s13_s14   ;;  %s598_s13 = sphi %s627_s13, %s690_s13   ;;  %s594_s12 = sphi %s625_s12, %s689_s12  }
   0x3   : > { %p41_p1 = scmp.ge.s32.totalorder %s39_s15, 3  ;;  %p214_p2 = scmp.lt.s32.totalorder %s602_s14, 4 }
   0x5   : > { %s692_s15 = smov (%p41_p1, %s39_s15), 0  ;;  %p215_p3 = pnand %p532_p0, %p214_p2 }
   0x6   : > { %p271_p4 = scmp.lt.s32.totalorder (!%p215_p3), %s594_s12, 2 }
   0x7   : > { %218 = sbr.rel (%p215_p3) target bundleno = 171 (0xab), region = 32 }
   0xc   : > { %vm319_vm0 = vcmask 261120   ;;  %v604_v0 = vmov 0.0   ;;  %s694_s12 = smov (!%p271_p4, %s594_s12), 2 }
   0xd   : > { %320 = vst.msk [vmem:[#allocation2] sm:$0xff] %vm319_vm0, %v604_v0  ;;  %s548_s16 = sshll.u32 %s694_s12, 5  ;;  %s301_s19 = scalar_lea.vmem %s687_s2, %s694_s12 }
   0xe   : > { %321 = vst.msk [vmem:[#allocation2 + $0x8] sm:$0xff] %vm319_vm0, %v604_v0  ;;  %s294_s22 = scalar_lea.vmem %s686_s1, %s548_s16  ;;  %s547_s23 = sshll.u32 %s694_s12, 4  ;;  %v579_v13 = vld [vmem:[%s301_s19] ss:$0 sm:$0xff] }
   0xf   : > { %v329_v1 = vld [vmem:[%s294_s22 + $0x18] sm:$0xff]  ;;  %v328_v2 = vld [vmem:[%s294_s22 + $0x10] sm:$0xff]  ;;  %v327_v3 = vld [vmem:[%s294_s22 + $0x8] sm:$0xff]  ;;  %s281_s26 = scalar_lea.vmem %s685_s0, %s547_s23  ;;  %s313_s29 = scalar_lea.vmem %s688_s3, %s547_s23 }
  0x10   : > { %539 = vmatpush.xpose.msk.msra.mxu0 %vm319_vm0, %v329_v1  ;;  %550 = vmatpush.xpose.msk.msra.mxu1 %vm319_vm0, %v329_v1  ;;  %v326_v4 = vld [vmem:[%s294_s22] sm:$0xff]  ;;  %v325_v6 = vld [vmem:[%s281_s26 + $0x8] sm:$0xff] }
  0x11   : > { %v324_v5 = vld [vmem:[%s281_s26] sm:$0xff] }
  0x14   : > { %540 = vmatpush.xpose.msk.msra.mxu0 %vm319_vm0, %v328_v2  ;;  %551 = vmatpush.xpose.msk.msra.mxu1 %vm319_vm0, %v328_v2  ;;  %v322_v7 = vld [vmem:[#allocation2] sm:$0xff] }
  0x15   : > { %v323_v8 = vld [vmem:[#allocation2 + $0x8] sm:$0xff] }
  0x18   : > { %541 = vmatpush.xpose.msk.msra.mxu0 %vm319_vm0, %v327_v3  ;;  %552 = vmatpush.xpose.msk.msra.mxu1 %vm319_vm0, %v327_v3 }
  0x1c   : > { %542 = vmatpush.xpose.msk.msra.mxu0 %vm319_vm0, %v326_v4  ;;  %553 = vmatpush.xpose.msk.msra.mxu1 %vm319_vm0, %v326_v4 }
  0x1f   : > { %543 = vmatmul.msk.f32.vlgmr.msra.gmra.mxu0 %vm319_vm0, %v324_v5  ;;  %544 = vmatmul.msk.f32.vlgmr.msra.gmra.mxu1 %vm319_vm0, %v325_v6 }
  0x9c   : > { %v366_v9 = vpop.f32.mrf.mxu0  ;;  %v369_v10 = vpop.f32.mrf.mxu1 }
  0x9d   : > { %v372_v11 = vadd.f32 %v366_v9, %v322_v7  ;;  %v373_v12 = vadd.f32 %v369_v10, %v323_v8 }
  0x9f   : > { %374 = vst.msk [vmem:[#allocation2] sm:$0xff] %vm319_vm0, %v372_v11 }
  0xa0   : > { %375 = vst.msk [vmem:[#allocation2 + $0x8] sm:$0xff] %vm319_vm0, %v373_v12 }
  0xa6   : > { %v379_v14 = vld [vmem:[#allocation2] sm:$0xff] }
  0xa7   : > { %v385_v15 = vadd.f32 %v579_v13, %v379_v14  ;;  %v380_v16 = vld [vmem:[#allocation2 + $0x8] sm:$0xff] }
  0xa8   : > { %v386_v17 = vadd.f32 %v579_v13, %v380_v16 }
  0xa9   : > { %387 = vst.msk [vmem:[%s313_s29] sm:$0xff] %vm319_vm0, %v385_v15 }
  0xaa   : > { %388 = vst.msk [vmem:[%s313_s29 + $0x8] sm:$0xff] %vm319_vm0, %v386_v17 }
  0xab PF: > { %s13_s14 = sadd.s32 1, %s602_s14   ;;  %s689_s12 = smov %s598_s13 }
  0xac   : > { %p10_p5 = scmp.ge.s32.totalorder %s13_s14, 5   ;;  %s690_s13 = smov %s692_s15 }
  0xae   :  { %12 = sbr.rel (!%p10_p5) target bundleno = 2 (0x2), region = 76 }

// kernel: multi_headed_attention.5
= control target key start
LH: loop header
LB: loop body
LE: loop exit
PB: predicated region body
PF: predicated region fallthrough
CT: control target
= control target key end

     0   :  { %vm19_vm0 = vcmask 261120   ;;  %v148_v1 = vmov 0.0   ;;  %s212_s0 = inlined_call_operand.vmem [shape: f32[1,16,32], index: 0, kind: input, shape index: {}]   ;;  %s213_s1 = inlined_call_operand.vmem [shape: f32[1,32,32], index: 1, kind: input, shape index: {}]   ;;  %s214_s2 = inlined_call_operand.vmem [shape: f32[1,1,32], index: 2, kind: input, shape index: {}]   ;;  %s215_s3 = inlined_call_operand.hbm [shape: f32[1,16,32], index: 3, kind: output, shape index: {}]  }
   0x1   :  { %v29_v0 = vld [vmem:[%s213_s1 + $0x18] sm:$0xff]  ;;  %20 = vst.msk [vmem:[#allocation2] sm:$0xff] %vm19_vm0, %v148_v1  ;;  %v28_v2 = vld [vmem:[%s213_s1 + $0x10] sm:$0xff] }
   0x2   :  { %107 = vmatpush.xpose.msk.msra.mxu0 %vm19_vm0, %v29_v0  ;;  %113 = vmatpush.xpose.msk.msra.mxu1 %vm19_vm0, %v29_v0  ;;  %21 = vst.msk [vmem:[#allocation2 + $0x8] sm:$0xff] %vm19_vm0, %v148_v1 }
   0x3   :  { %8 = vsyncpa [#allocation4], 0  ;;  %v27_v3 = vld [vmem:[%s213_s1 + $0x8] sm:$0xff]  ;;  %v26_v4 = vld [vmem:[%s213_s1] sm:$0xff]  ;;  %s149_s25 = smov [#allocation3]   ;;  %s95_s28 = sshll.u32 %s215_s3, 4  ;;  %s96_s28 = int_to_ptr.hbm [resolvable:$true] %s95_s28 }
   0x4   :  { %v24_v5 = vld [vmem:[%s212_s0] sm:$0xff]  ;;  %v25_v6 = vld [vmem:[%s212_s0 + $0x8] sm:$0xff]  ;;  %s93_s0 = sshll.u32 %s149_s25, 4  ;;  %s150_s29 = smov 128   ;;  %s94_s0 = int_to_ptr.vmem [resolvable:$true] %s93_s0 }
   0x5   :  { %v121_v13 = vld [vmem:[%s214_s2] ss:$0 sm:$0xff]  ;;  %s151_s30 = smov 8  }
   0x6   :  { %108 = vmatpush.xpose.msk.msra.mxu0 %vm19_vm0, %v28_v2  ;;  %114 = vmatpush.xpose.msk.msra.mxu1 %vm19_vm0, %v28_v2 }
   0x8   :  { %v22_v7 = vld [vmem:[#allocation2] sm:$0xff] }
   0x9   :  { %v23_v8 = vld [vmem:[#allocation2 + $0x8] sm:$0xff] }
   0xa   :  { %109 = vmatpush.xpose.msk.msra.mxu0 %vm19_vm0, %v27_v3  ;;  %115 = vmatpush.xpose.msk.msra.mxu1 %vm19_vm0, %v27_v3 }
   0xe   :  { %110 = vmatpush.xpose.msk.msra.mxu0 %vm19_vm0, %v26_v4  ;;  %116 = vmatpush.xpose.msk.msra.mxu1 %vm19_vm0, %v26_v4 }
  0x11   :  { %111 = vmatmul.msk.f32.vlgmr.msra.gmra.mxu0 %vm19_vm0, %v24_v5  ;;  %112 = vmatmul.msk.f32.vlgmr.msra.gmra.mxu1 %vm19_vm0, %v25_v6 }
  0x8e   :  { %v66_v9 = vpop.f32.mrf.mxu0  ;;  %v69_v10 = vpop.f32.mrf.mxu1 }
  0x8f   :  { %v72_v11 = vadd.f32 %v66_v9, %v22_v7  ;;  %v73_v12 = vadd.f32 %v69_v10, %v23_v8 }
  0x91   :  { %74 = vst.msk [vmem:[#allocation2] sm:$0xff] %vm19_vm0, %v72_v11 }
  0x92   :  { %75 = vst.msk [vmem:[#allocation2 + $0x8] sm:$0xff] %vm19_vm0, %v73_v12 }
  0x98   :  { %v79_v14 = vld [vmem:[#allocation2] sm:$0xff] }
  0x99   :  { %v80_v15 = vld [vmem:[#allocation2 + $0x8] sm:$0xff]  ;;  %v85_v16 = vadd.f32 %v121_v13, %v79_v14 }
  0x9a   :  { %v86_v17 = vadd.f32 %v121_v13, %v80_v15 }
  0x9b   :  { %87 = vst.msk [vmem:[#allocation3] sm:$0xff] %vm19_vm0, %v85_v16 }
  0x9c   :  { %88 = vst.msk [vmem:[#allocation3 + $0x8] sm:$0xff] %vm19_vm0, %v86_v17 }
  0x9d   :  { %101 = dma.vmem_to_hbm [thread:$0]  %s94_s0, 256, %s96_s28, [#allocation4], %s150_s29, %s150_s29, %s151_s30  }
  0x9e   :  { %146 = dma.done.wait [#allocation4], 256  }
  0x9f   :  { %147 = vsyncadd [#allocation4], 4294967040 }
  0xa0   :  { %106 = vsyncpa [#allocation4], 1 }

// kernel: multi_headed_attention.4
= control target key start
LH: loop header
LB: loop body
LE: loop exit
PB: predicated region body
PF: predicated region fallthrough
CT: control target
= control target key end

     0   :  { %s723_s12 = smov 0   ;;  %s725_s13 = smov 0   ;;  %s798_s0 = inlined_call_operand.vmem [shape: f32[3,2,4,8,8], index: 0, kind: input, shape index: {}, may-alias: {0,1,2}]   ;;  %s799_s1 = inlined_call_operand.vmem [shape: f32[3,2,4,8,8], index: 1, kind: input, shape index: {}, may-alias: {0,1,2}]   ;;  %s800_s2 = inlined_call_operand.vmem [shape: f32[3,2,4,8,8], index: 2, kind: input, shape index: {}, may-alias: {0,1,2}]   ;;  %s801_s3 = inlined_call_operand.vmem [shape: f32[2,4,8,8], index: 3, kind: output, shape index: {}]  }
   0x1   :  { %s727_s14 = smov 0   ;;  %s729_s15 = smov 0  }
   0x2   :  { %s731_s16 = smov 0  }
   0x3 LB: > { %s35_s17 = sadd.s32 1, %s690_s14  ;;  %s39_s18 = sadd.s32 1, %s694_s15  ;;  %s698_s16 = sphi %s731_s16, %s13_s16   ;;  %s694_s15 = sphi %s729_s15, %s805_s15   ;;  %s690_s14 = sphi %s727_s14, %s804_s14   ;;  %s686_s13 = sphi %s725_s13, %s803_s13   ;;  %s682_s12 = sphi %s723_s12, %s802_s12  }
   0x4   : > { %p37_p0 = scmp.ge.s32.totalorder %s35_s17, 4  ;;  %p592_p1 = scmp.ge.s32.totalorder %s698_s16, 1 }
   0x5   : > { %p219_p2 = scmp.lt.s32.totalorder %s698_s16, 9 }
   0x6   : > { %s807_s17 = smov (%p37_p0, %s35_s17), 0  ;;  %s809_s18 = smov (!%p37_p0, %s39_s18), %s694_s15 }
   0x7   : > { %p220_p3 = pnand %p592_p1, %p219_p2  ;;  %p41_p4 = scmp.ge.s32.totalorder %s809_s18, 2 }
   0x8   : > { %p279_p5 = scmp.lt.s32.totalorder (!%p220_p3), %s686_s13, 1  ;;  %p281_p6 = scmp.lt.s32.totalorder (!%p220_p3), %s682_s12, 3 }
   0x9   : > { %s811_s18 = smov (%p41_p4, %s809_s18), 0  ;;  %223 = sbr.rel (%p220_p3) target bundleno = 622 (0x26e), region = 32 }
   0xe   : > { %s813_s13 = smov (!%p279_p5, %s686_s13), 1  ;;  %s815_s12 = smov (!%p281_p6, %s682_s12), 3  ;;  %vm332_vm0 = vcmask 64512   ;;  %vm329_vm1 = vcmask 7168   ;;  %v700_v3 = vmov -inf   ;;  %v701_v6 = vmov 0  }
   0xf   : > { %s593_s19 = sshll.u32 %s813_s13, 2  ;;  %330 = vst.msk [vmem:[#allocation2] sm:$0xff] %vm329_vm1, %v700_v3  ;;  %651 = vset.pattern.permute.xlu0 %v701_v6  ;;  %652 = vset.pattern.permute.xlu1 %v701_v6  ;;  %v702_v7 = vmov 0.0  }
  0x10   : > { %s287_s20 = sadd.s32 %s593_s19, %s815_s12  ;;  %653 = vset.pattern.permute.xlu2 %v701_v6  ;;  %331 = vst.msk [vmem:[#allocation3] sm:$0xff] %vm329_vm1, %v702_v7 }
  0x11   : > { %s753_s21 = sshll.u32 %s287_s20, 3  ;;  %333 = vst.msk [vmem:[#allocation4] sm:$0xff] %vm332_vm0, %v702_v7 }
  0x12   : > { %s516_s24 = scalar_lea.vmem %s799_s1, %s753_s21  ;;  %s289_s27 = scalar_lea.vmem %s798_s0, %s753_s21 }
  0x13   : > { %v601_v0 = vld [vmem:[%s516_s24 + $0x40] sm:$0xff]  ;;  %s522_s30 = scalar_lea.vmem %s800_s2, %s753_s21  ;;  %s324_s6 = scalar_lea.vmem %s801_s3, %s753_s21 }
  0x14   : > { %v334_v1 = vld [vmem:[%s289_s27] sm:$0xff]  ;;  %603 = vmatpush.xpose.msk.msra.mxu0 %vm332_vm0, %v601_v0 }
  0x15   : > { %v335_v2 = vmul.f32 0.35355338, %v334_v1  ;;  %v602_v12 = vld [vmem:[%s522_s30 + $0x80] sm:$0xff] }
  0x16   : > { %v365_v8 = vld [vmem:[#allocation2] sm:$0xff]  ;;  %414 = vmatpush.msra.mxu1 %v602_v12 }
  0x17   : > { %604 = vmatmul.msk.f32.vlgmr.msra.gmra.mxu0 %vm332_vm0, %v335_v2  ;;  %v381_v20 = vld [vmem:[#allocation3] sm:$0xff] }
  0x18   : > { %v389_v26 = vld [vmem:[#allocation4] sm:$0xff] }
  0x94   : > { %v362_v4 = vpop.f32.mrf.mxu0 }
  0x95   : > { %v366_v5 = vsel %vm332_vm0, %v362_v4, -inf }
  0x96   : > { %367 = vmax.xlane.f32.xlu0 %v366_v5 }
 0x109   : > { %v368_v9 = vpop.xlane.xlu0 %367 }
 0x10a   : > { %v369_v10 = vmax.f32 %v365_v8, %v368_v9 }
 0x10c   : > { %v370_v11 = vsub.f32 %v365_v8, %v369_v10  ;;  %421 = vst.msk [vmem:[#allocation2] sm:$0xff] %vm329_vm1, %v369_v10  ;;  %375 = vperm.xlu0 %651, %v369_v10  }
 0x10e   : > { %v371_v18 = vmul.f32 1.442695, %v370_v11 }
 0x17e   : > { %v376_v13 = vpop.permute.xlu0 %375 }
 0x17f   : > { %v378_v14 = vsub.f32 %v362_v4, %v376_v13 }
 0x181   : > { %v379_v15 = vmul.f32 1.442695, %v378_v14 }
 0x183   : > { %654 = vpow2.f32 %v379_v15 }
 0x184   : > { %656 = vpow2.f32 %v371_v18 }
 0x189   : > { %v655_v16 = vpop.eup %654 }
 0x18a   : > { %605 = vmatmul.msk.f32.vlgmr.msra.gmra.mxu1 %vm332_vm0, %v655_v16  ;;  %v383_v17 = vsel %vm332_vm0, %v655_v16, 0.0  ;;  %v657_v19 = vpop.eup %656 }
 0x18b   : > { %384 = vadd.xlane.f32.xlu1 %v383_v17  ;;  %v382_v21 = vmul.f32 %v657_v19, %v381_v20 }
 0x1a4   : > { %392 = vperm.xlu1 %652, %v657_v19  }
 0x1fe   : > { %v385_v22 = vpop.xlane.xlu1 %384 }
 0x1ff   : > { %v386_v23 = vadd.f32 %v385_v22, %v382_v21 }
 0x201   : > { %388 = vst.msk [vmem:[#allocation3] sm:$0xff] %vm329_vm1, %v386_v23 }
 0x207   : > { %v416_v29 = vpop.f32.mrf.mxu1 }
 0x208   : > { %v426_v24 = vld [vmem:[#allocation3] sm:$0xff] }
 0x209   : > { %658 = vrcp.f32 %v426_v24 }
 0x20f   : > { %v659_v25 = vpop.eup %658 }
 0x210   : > { %430 = vperm.xlu2 %653, %v659_v25  }
 0x216   : > { %v393_v27 = vpop.permute.xlu1 %392 }
 0x217   : > { %v395_v28 = vmul.f32 %v393_v27, %v389_v26 }
 0x219   : > { %v419_v30 = vadd.f32 %v416_v29, %v395_v28 }
 0x21b   : > { %420 = vst.msk [vmem:[#allocation4] sm:$0xff] %vm332_vm0, %v419_v30 }
 0x222   : > { %v425_v31 = vld [vmem:[#allocation4] sm:$0xff] }
 0x26a   : > { %v431_v32 = vpop.permute.xlu2 %430 }
 0x26b   : > { %v433_v33 = vmul.f32 %v431_v32, %v425_v31 }
 0x26d   : > { %434 = vst.msk [vmem:[%s324_s6] sm:$0xff] %vm332_vm0, %v433_v33 }
 0x26e PF: > { %s13_s16 = sadd.s32 1, %s698_s16   ;;  %s802_s12 = smov %s690_s14 }
 0x26f   : > { %p10_p7 = scmp.ge.s32.totalorder %s13_s16, 10   ;;  %s803_s13 = smov %s694_s15 }
 0x270   : > { %s804_s14 = smov %s807_s17  ;;  %s805_s15 = smov %s811_s18 }
 0x271   :  { %12 = sbr.rel (!%p10_p7) target bundleno = 3 (0x3), region = 76 }

</bundles_post_ra>
